<compile_context>
chip_gen: v5e
topology: v5e:2x2
jax: 0.10.0
libtpu: 0.0.40
codegen_flags: <defaults>
</compile_context>

<pallas_src>
import jax
import jax.numpy as jnp
from jax import lax
from jax.experimental import pallas as pl
from jax.experimental.pallas import tpu as pltpu
import numpy as np

# ------------------------- sizes (small, deterministic) -------------------------
N = 2            # batch
C_IN = 4         # input image channels (stand-in for 3)
H_IN = W_IN = 16
C_FEAT = 128     # backbone feature channels (stand-in for 2048)
C_MID = 64       # attention hidden channels (stand-in for 512)
C_MID_PAD = 128  # lane-padded hidden width (fills MXU / VPU lanes)
H = W = 8        # feature spatial size (stride-2 backbone stand-in)
C_GEO = 8
K_OUT = 128      # fused (score | geo) output padded to a full 128-lane width
H_TILE = 4       # output rows per grid step (multiple-of-8 row count per tile)


# ------------------------------ Pallas kernel -----------------------------------
def east_head_kernel(feat_ref, w1_ref, b1_ref, w2_ref, b2_ref,
                     wsg_ref, bsg_ref, out_ref):
    """One (batch, H-tile) step of the fused attention head + (score|geo) convs.

    feat_ref : (1, H_TILE+2, W+2, C) bf16  feature tile with 1-pixel halo
    w1_ref   : (9, C, C_MID_PAD)     bf16  3x3 conv weights, tap-major (ky*3+kx)
    b1_ref   : (1, C_MID_PAD)        f32
    w2_ref   : (1, C_MID_PAD)        f32   attention 1x1 conv as a row vector
    b2_ref   : (1, 1)                f32   scalar bias (SMEM)
    wsg_ref  : (C, K_OUT)            bf16  fused score | geo | zero-pad weights
    bsg_ref  : (1, K_OUT)            f32
    out_ref  : (1, H_TILE*W, K_OUT)  bf16  col 0 = score, cols 1..8 = geo
    """
    c = wsg_ref.shape[0]
    cmid = w1_ref.shape[2]
    ht = H_TILE
    wt = feat_ref.shape[2] - 2
    m = ht * wt

    feat_tile = feat_ref[0]                                   # (H_TILE+2, W+2, C) bf16

    # 3x3 "same" conv as 9 shifted (M, C) x (C, Cm) matmuls, f32 accumulation.
    hid = jnp.zeros((m, cmid), jnp.float32)
    for ky in range(3):
        for kx in range(3):
            tap_in = feat_tile[ky:ky + ht, kx:kx + wt, :].reshape(m, c)
            hid = hid + jnp.dot(tap_in, w1_ref[ky * 3 + kx],
                                preferred_element_type=jnp.float32)
    hidden = jnp.maximum(hid + b1_ref[...], 0.0)              # (M, C_MID_PAD) f32

    # Attention logit: VPU multiply + XLU lane reduce; sigmoid via EUP exp + vrcp.
    logit = jnp.sum(hidden * w2_ref[...], axis=-1, keepdims=True) + b2_ref[0, 0]
    att = pl.reciprocal(1.0 + jnp.exp(-logit), approx=True)   # (M, 1) f32

    # Attended features directly in bf16 (center of the halo'd tile).
    feat_c = feat_tile[1:1 + ht, 1:1 + wt, :].reshape(m, c)   # (M, C) bf16
    attended = feat_c * att.astype(jnp.bfloat16)              # (M, C) bf16

    # Fused score/geo 1x1 convs: one lane-dense matmul, one unmasked bf16 store.
    out = jnp.dot(attended, wsg_ref[...], preferred_element_type=jnp.float32)
    out_ref[0] = (out + bsg_ref[...]).astype(out_ref.dtype)


def east_head_pallas(feat_nhwc, params, h_tile=H_TILE):
    """feat_nhwc: (N, H, W, C) -> (score (N,H,W,1) f32, geo (N,H,W,8) f32)."""
    n, h, w, c = feat_nhwc.shape
    cm = params["w1"].shape[3]
    num_t = h // h_tile
    nb = n * num_t                      # grid size (one step per batch x H-tile)
    m_tile = h_tile * w

    # Spatially padded features; per-tile blocks with a 1-row halo each side.
    # Only halo rows are duplicated in HBM (not 9x im2col inflation).
    feat_pad = jnp.pad(feat_nhwc, ((0, 0), (1, 1), (1, 1), (0, 0))).astype(jnp.bfloat16)
    tiles = jnp.stack([feat_pad[:, t * h_tile: t * h_tile + h_tile + 2]
                       for t in range(num_t)], axis=1)        # (N, T, ht+2, W+2, C)
    tiles = tiles.reshape(nb, h_tile + 2, w + 2, c)

    # Pad C_MID -> 128 lanes (pad hidden cols are relu(0)=0; w2 pad cols are 0).
    w1p = jnp.pad(params["w1"], ((0, 0), (0, 0), (0, 0), (0, C_MID_PAD - cm)))
    w1p = w1p.reshape(9, c, C_MID_PAD).astype(jnp.bfloat16)   # tap-major: ky*3+kx
    b1p = jnp.pad(params["b1"], ((0, 0), (0, C_MID_PAD - cm)))
    w2p = jnp.pad(params["w2"].reshape(1, cm), ((0, 0), (0, C_MID_PAD - cm)))

    # Fuse score (1 ch) + geo (8 ch) into one lane-dense, zero-padded weight/bias.
    wsg = jnp.concatenate([params["ws"], params["wg"]], axis=1)        # (C, 9)
    wsg = jnp.pad(wsg, ((0, 0), (0, K_OUT - 1 - C_GEO))).astype(jnp.bfloat16)
    bsg = jnp.concatenate([params["bs"], params["bg"]], axis=1)        # (1, 9)
    bsg = jnp.pad(bsg, ((0, 0), (0, K_OUT - 1 - C_GEO)))

    const3 = lambda i: (0, 0, 0)
    const2 = lambda i: (0, 0)

    out = pl.pallas_call(
        east_head_kernel,
        out_shape=jax.ShapeDtypeStruct((nb, m_tile, K_OUT), jnp.bfloat16),
        grid=(nb,),
        in_specs=[
            pl.BlockSpec((1, h_tile + 2, w + 2, c), lambda i: (i, 0, 0, 0)),
            pl.BlockSpec((9, c, C_MID_PAD), const3),           # resident weights
            pl.BlockSpec((1, C_MID_PAD), const2),
            pl.BlockSpec((1, C_MID_PAD), const2),
            pl.BlockSpec(memory_space=pltpu.MemorySpace.SMEM), # scalar bias b2
            pl.BlockSpec((c, K_OUT), const2),
            pl.BlockSpec((1, K_OUT), const2),
        ],
        out_specs=pl.BlockSpec((1, m_tile, K_OUT), lambda i: (i, 0, 0)),
        compiler_params=pltpu.CompilerParams(
            dimension_semantics=("parallel",),
            # Toy sizes are tiny; re-derive per generation at production scale
            # (v7x has 64 MiB VMEM vs 128 MiB on v5e/v6e).
            vmem_limit_bytes=32 * 1024 * 1024),
    )(tiles, w1p, b1p, w2p, params["b2"], wsg, bsg)

    out = out.reshape(n, num_t, h_tile, w, K_OUT).reshape(n, h, w, K_OUT)
    score = out[..., 0:1].astype(jnp.float32)
    geo = out[..., 1:1 + C_GEO].astype(jnp.float32)
    return score, geo


# ------------------------------ wrapper (NCHW API) -------------------------------
def east_forward(x_nchw, params):
    """Mirrors EASTWithAttention.forward: x (NCHW) -> (score, geo), both NCHW."""
    # TODO(synk): pretrained ResNet50 backbone (torch.hub weights) is not replicated;
    #             a single deterministic 3x3 stride-2 conv + ReLU stands in for it.
    x_nhwc = jnp.transpose(x_nchw, (0, 2, 3, 1))              # API boundary only
    feat = lax.conv_general_dilated(
        x_nhwc, params["w_bb"], window_strides=(2, 2), padding="SAME",
        dimension_numbers=("NHWC", "HWIO", "NHWC"))
    feat = jnp.maximum(feat + params["b_bb"], 0.0)            # NHWC throughout

    score_nhwc, geo_nhwc = east_head_pallas(feat, params)
    score = jnp.transpose(score_nhwc, (0, 3, 1, 2))           # API boundary only
    geo = jnp.transpose(geo_nhwc, (0, 3, 1, 2))
    return score, geo


# --------------------------- pure-JAX reference head -----------------------------
def east_head_ref(feat_nhwc, params):
    conv = lambda x, w: lax.conv_general_dilated(
        x, w, (1, 1), "SAME", dimension_numbers=("NHWC", "HWIO", "NHWC"))
    hid = jnp.maximum(conv(feat_nhwc, params["w1"]) + params["b1"][0], 0.0)
    att = jax.nn.sigmoid(hid @ params["w2"] + params["b2"][0])
    attended = feat_nhwc * att
    score = attended @ params["ws"] + params["bs"][0]
    geo = attended @ params["wg"] + params["bg"][0]
    return score, geo


def init_params(key):
    ks = jax.random.split(key, 6)
    s = lambda fan_in: 1.0 / np.sqrt(fan_in)
    return {
        "w_bb": jax.random.normal(ks[0], (3, 3, C_IN, C_FEAT), jnp.float32) * s(C_IN * 9),
        "b_bb": jnp.zeros((C_FEAT,), jnp.float32),
        "w1": jax.random.normal(ks[1], (3, 3, C_FEAT, C_MID), jnp.float32) * s(C_FEAT * 9),
        "b1": jnp.zeros((1, C_MID), jnp.float32),
        "w2": jax.random.normal(ks[2], (C_MID, 1), jnp.float32) * s(C_MID),
        "b2": jnp.zeros((1, 1), jnp.float32),
        "ws": jax.random.normal(ks[3], (C_FEAT, 1), jnp.float32) * s(C_FEAT),
        "bs": jnp.zeros((1, 1), jnp.float32),
        "wg": jax.random.normal(ks[4], (C_FEAT, C_GEO), jnp.float32) * s(C_FEAT),
        "bg": jnp.zeros((1, C_GEO), jnp.float32),
    }


if __name__ == "__main__":
    key = jax.random.PRNGKey(0)
    kx, kp = jax.random.split(key)
    x = jax.random.normal(kx, (N, C_IN, H_IN, W_IN), jnp.float32)
    params = init_params(kp)

    score, geo = jax.jit(east_forward)(x, params)
    jax.block_until_ready((score, geo))
    assert score.shape == (N, 1, H, W) and geo.shape == (N, C_GEO, H, W)

    # Correctness check of the Pallas head against a pure-JAX f32 reference.
    # Tolerance loosened because the kernel uses bf16 MXU inputs / bf16 attended
    # features / bf16 output stores (f32 accumulation throughout) and an
    # approximate EUP reciprocal for the sigmoid.
    feat_nhwc = lax.conv_general_dilated(
        jnp.transpose(x, (0, 2, 3, 1)), params["w_bb"], (2, 2), "SAME",
        dimension_numbers=("NHWC", "HWIO", "NHWC"))
    feat_nhwc = jnp.maximum(feat_nhwc + params["b_bb"], 0.0)
    score_ref, geo_ref = east_head_ref(feat_nhwc, params)
    np.testing.assert_allclose(np.asarray(jnp.transpose(score, (0, 2, 3, 1))),
                               np.asarray(score_ref), rtol=4e-2, atol=4e-2)
    np.testing.assert_allclose(np.asarray(jnp.transpose(geo, (0, 2, 3, 1))),
                               np.asarray(geo_ref), rtol=4e-2, atol=4e-2)

    print("KERNEL_OK")
</pallas_src>

<mosaic_0001>
module attributes {stable_mosaic.version = 11 : i64} {
  func.func @east_head_kernel(%arg0: i32, %arg1: memref<1x6x10x128xbf16, #tpu.memory_space<vmem>>, %arg2: memref<9x128x128xbf16, #tpu.memory_space<vmem>>, %arg3: memref<1x128xf32, #tpu.memory_space<vmem>>, %arg4: memref<1x128xf32, #tpu.memory_space<vmem>>, %arg5: memref<1x1xf32, #tpu.memory_space<smem>>, %arg6: memref<128x128xbf16, #tpu.memory_space<vmem>>, %arg7: memref<1x128xf32, #tpu.memory_space<vmem>>, %arg8: memref<1x32x128xbf16, #tpu.memory_space<vmem>>) attributes {dimension_semantics = [#tpu.dimension_semantics<parallel>], iteration_bounds = array<i64: 4>, scalar_prefetch = 0 : i64, scratch_operands = 0 : i64, tpu.core_type = #tpu.core_type<tc>, window_params = [{transform_indices = @transform_0, window_bounds = array<i64: 1, 6, 10, 128>}, {pipeline_mode = #tpu.pipeline_mode<synchronous>, transform_indices = @transform_1, window_bounds = array<i64: 9, 128, 128>}, {pipeline_mode = #tpu.pipeline_mode<synchronous>, transform_indices = @transform_2, window_bounds = array<i64: 1, 128>}, {pipeline_mode = #tpu.pipeline_mode<synchronous>, transform_indices = @transform_3, window_bounds = array<i64: 1, 128>}, {transform_indices = @transform_4, window_bounds = array<i64: 1, 1>}, {pipeline_mode = #tpu.pipeline_mode<synchronous>, transform_indices = @transform_5, window_bounds = array<i64: 128, 128>}, {pipeline_mode = #tpu.pipeline_mode<synchronous>, transform_indices = @transform_6, window_bounds = array<i64: 1, 128>}, {transform_indices = @transform_7, window_bounds = array<i64: 1, 32, 128>}]} {
    %c0 = arith.constant 0 : index
    %c0_0 = arith.constant 0 : index
    %c0_1 = arith.constant 0 : index
    %c0_2 = arith.constant 0 : index
    %0 = vector.load %arg1[%c0, %c0_0, %c0_1, %c0_2] : memref<1x6x10x128xbf16, #tpu.memory_space<vmem>>, vector<1x6x10x128xbf16>
    %1 = vector.shape_cast %0 : vector<1x6x10x128xbf16> to vector<6x10x128xbf16>
    %cst = arith.constant 0.000000e+00 : f32
    %2 = vector.broadcast %cst : f32 to vector<32x128xf32>
    %3 = vector.extract_strided_slice %1 {offsets = [0, 0, 0], sizes = [4, 8, 128], strides = [1, 1, 1]} : vector<6x10x128xbf16> to vector<4x8x128xbf16>
    %4 = vector.shape_cast %3 : vector<4x8x128xbf16> to vector<32x128xbf16>
    %c0_3 = arith.constant 0 : index
    %c0_4 = arith.constant 0 : index
    %c0_5 = arith.constant 0 : index
    %5 = vector.load %arg2[%c0_3, %c0_4, %c0_5] : memref<9x128x128xbf16, #tpu.memory_space<vmem>>, vector<1x128x128xbf16>
    %6 = vector.shape_cast %5 : vector<1x128x128xbf16> to vector<128x128xbf16>
    %cst_6 = arith.constant dense<0.000000e+00> : vector<32x128xf32>
    %7 = tpu.matmul %4, %6, %cst_6 {dimension_numbers = #tpu.dot_dimension_numbers<[1], [0], [0], [1], [0, 0, 1, 1], [], []>} : vector<32x128xbf16>, vector<128x128xbf16>, vector<32x128xf32> -> vector<32x128xf32>
    %8 = arith.addf %2, %7 : vector<32x128xf32>
    %9 = vector.extract_strided_slice %1 {offsets = [0, 1, 0], sizes = [4, 8, 128], strides = [1, 1, 1]} : vector<6x10x128xbf16> to vector<4x8x128xbf16>
    %10 = vector.shape_cast %9 : vector<4x8x128xbf16> to vector<32x128xbf16>
    %c1 = arith.constant 1 : index
    %c0_7 = arith.constant 0 : index
    %c0_8 = arith.constant 0 : index
    %11 = vector.load %arg2[%c1, %c0_7, %c0_8] : memref<9x128x128xbf16, #tpu.memory_space<vmem>>, vector<1x128x128xbf16>
    %12 = vector.shape_cast %11 : vector<1x128x128xbf16> to vector<128x128xbf16>
    %cst_9 = arith.constant dense<0.000000e+00> : vector<32x128xf32>
    %13 = tpu.matmul %10, %12, %cst_9 {dimension_numbers = #tpu.dot_dimension_numbers<[1], [0], [0], [1], [0, 0, 1, 1], [], []>} : vector<32x128xbf16>, vector<128x128xbf16>, vector<32x128xf32> -> vector<32x128xf32>
    %14 = arith.addf %8, %13 : vector<32x128xf32>
    %15 = vector.extract_strided_slice %1 {offsets = [0, 2, 0], sizes = [4, 8, 128], strides = [1, 1, 1]} : vector<6x10x128xbf16> to vector<4x8x128xbf16>
    %16 = vector.shape_cast %15 : vector<4x8x128xbf16> to vector<32x128xbf16>
    %c2 = arith.constant 2 : index
    %c0_10 = arith.constant 0 : index
    %c0_11 = arith.constant 0 : index
    %17 = vector.load %arg2[%c2, %c0_10, %c0_11] : memref<9x128x128xbf16, #tpu.memory_space<vmem>>, vector<1x128x128xbf16>
    %18 = vector.shape_cast %17 : vector<1x128x128xbf16> to vector<128x128xbf16>
    %cst_12 = arith.constant dense<0.000000e+00> : vector<32x128xf32>
    %19 = tpu.matmul %16, %18, %cst_12 {dimension_numbers = #tpu.dot_dimension_numbers<[1], [0], [0], [1], [0, 0, 1, 1], [], []>} : vector<32x128xbf16>, vector<128x128xbf16>, vector<32x128xf32> -> vector<32x128xf32>
    %20 = arith.addf %14, %19 : vector<32x128xf32>
    %21 = vector.extract_strided_slice %1 {offsets = [1, 0, 0], sizes = [4, 8, 128], strides = [1, 1, 1]} : vector<6x10x128xbf16> to vector<4x8x128xbf16>
    %22 = vector.shape_cast %21 : vector<4x8x128xbf16> to vector<32x128xbf16>
    %c3 = arith.constant 3 : index
    %c0_13 = arith.constant 0 : index
    %c0_14 = arith.constant 0 : index
    %23 = vector.load %arg2[%c3, %c0_13, %c0_14] : memref<9x128x128xbf16, #tpu.memory_space<vmem>>, vector<1x128x128xbf16>
    %24 = vector.shape_cast %23 : vector<1x128x128xbf16> to vector<128x128xbf16>
    %cst_15 = arith.constant dense<0.000000e+00> : vector<32x128xf32>
    %25 = tpu.matmul %22, %24, %cst_15 {dimension_numbers = #tpu.dot_dimension_numbers<[1], [0], [0], [1], [0, 0, 1, 1], [], []>} : vector<32x128xbf16>, vector<128x128xbf16>, vector<32x128xf32> -> vector<32x128xf32>
    %26 = arith.addf %20, %25 : vector<32x128xf32>
    %27 = vector.extract_strided_slice %1 {offsets = [1, 1, 0], sizes = [4, 8, 128], strides = [1, 1, 1]} : vector<6x10x128xbf16> to vector<4x8x128xbf16>
    %28 = vector.shape_cast %27 : vector<4x8x128xbf16> to vector<32x128xbf16>
    %c4 = arith.constant 4 : index
    %c0_16 = arith.constant 0 : index
    %c0_17 = arith.constant 0 : index
    %29 = vector.load %arg2[%c4, %c0_16, %c0_17] : memref<9x128x128xbf16, #tpu.memory_space<vmem>>, vector<1x128x128xbf16>
    %30 = vector.shape_cast %29 : vector<1x128x128xbf16> to vector<128x128xbf16>
    %cst_18 = arith.constant dense<0.000000e+00> : vector<32x128xf32>
    %31 = tpu.matmul %28, %30, %cst_18 {dimension_numbers = #tpu.dot_dimension_numbers<[1], [0], [0], [1], [0, 0, 1, 1], [], []>} : vector<32x128xbf16>, vector<128x128xbf16>, vector<32x128xf32> -> vector<32x128xf32>
    %32 = arith.addf %26, %31 : vector<32x128xf32>
    %33 = vector.extract_strided_slice %1 {offsets = [1, 2, 0], sizes = [4, 8, 128], strides = [1, 1, 1]} : vector<6x10x128xbf16> to vector<4x8x128xbf16>
    %34 = vector.shape_cast %33 : vector<4x8x128xbf16> to vector<32x128xbf16>
    %c5 = arith.constant 5 : index
    %c0_19 = arith.constant 0 : index
    %c0_20 = arith.constant 0 : index
    %35 = vector.load %arg2[%c5, %c0_19, %c0_20] : memref<9x128x128xbf16, #tpu.memory_space<vmem>>, vector<1x128x128xbf16>
    %36 = vector.shape_cast %35 : vector<1x128x128xbf16> to vector<128x128xbf16>
    %cst_21 = arith.constant dense<0.000000e+00> : vector<32x128xf32>
    %37 = tpu.matmul %34, %36, %cst_21 {dimension_numbers = #tpu.dot_dimension_numbers<[1], [0], [0], [1], [0, 0, 1, 1], [], []>} : vector<32x128xbf16>, vector<128x128xbf16>, vector<32x128xf32> -> vector<32x128xf32>
    %38 = arith.addf %32, %37 : vector<32x128xf32>
    %39 = vector.extract_strided_slice %1 {offsets = [2, 0, 0], sizes = [4, 8, 128], strides = [1, 1, 1]} : vector<6x10x128xbf16> to vector<4x8x128xbf16>
    %40 = vector.shape_cast %39 : vector<4x8x128xbf16> to vector<32x128xbf16>
    %c6 = arith.constant 6 : index
    %c0_22 = arith.constant 0 : index
    %c0_23 = arith.constant 0 : index
    %41 = vector.load %arg2[%c6, %c0_22, %c0_23] : memref<9x128x128xbf16, #tpu.memory_space<vmem>>, vector<1x128x128xbf16>
    %42 = vector.shape_cast %41 : vector<1x128x128xbf16> to vector<128x128xbf16>
    %cst_24 = arith.constant dense<0.000000e+00> : vector<32x128xf32>
    %43 = tpu.matmul %40, %42, %cst_24 {dimension_numbers = #tpu.dot_dimension_numbers<[1], [0], [0], [1], [0, 0, 1, 1], [], []>} : vector<32x128xbf16>, vector<128x128xbf16>, vector<32x128xf32> -> vector<32x128xf32>
    %44 = arith.addf %38, %43 : vector<32x128xf32>
    %45 = vector.extract_strided_slice %1 {offsets = [2, 1, 0], sizes = [4, 8, 128], strides = [1, 1, 1]} : vector<6x10x128xbf16> to vector<4x8x128xbf16>
    %46 = vector.shape_cast %45 : vector<4x8x128xbf16> to vector<32x128xbf16>
    %c7 = arith.constant 7 : index
    %c0_25 = arith.constant 0 : index
    %c0_26 = arith.constant 0 : index
    %47 = vector.load %arg2[%c7, %c0_25, %c0_26] : memref<9x128x128xbf16, #tpu.memory_space<vmem>>, vector<1x128x128xbf16>
    %48 = vector.shape_cast %47 : vector<1x128x128xbf16> to vector<128x128xbf16>
    %cst_27 = arith.constant dense<0.000000e+00> : vector<32x128xf32>
    %49 = tpu.matmul %46, %48, %cst_27 {dimension_numbers = #tpu.dot_dimension_numbers<[1], [0], [0], [1], [0, 0, 1, 1], [], []>} : vector<32x128xbf16>, vector<128x128xbf16>, vector<32x128xf32> -> vector<32x128xf32>
    %50 = arith.addf %44, %49 : vector<32x128xf32>
    %51 = vector.extract_strided_slice %1 {offsets = [2, 2, 0], sizes = [4, 8, 128], strides = [1, 1, 1]} : vector<6x10x128xbf16> to vector<4x8x128xbf16>
    %52 = vector.shape_cast %51 : vector<4x8x128xbf16> to vector<32x128xbf16>
    %c8 = arith.constant 8 : index
    %c0_28 = arith.constant 0 : index
    %c0_29 = arith.constant 0 : index
    %53 = vector.load %arg2[%c8, %c0_28, %c0_29] : memref<9x128x128xbf16, #tpu.memory_space<vmem>>, vector<1x128x128xbf16>
    %54 = vector.shape_cast %53 : vector<1x128x128xbf16> to vector<128x128xbf16>
    %cst_30 = arith.constant dense<0.000000e+00> : vector<32x128xf32>
    %55 = tpu.matmul %52, %54, %cst_30 {dimension_numbers = #tpu.dot_dimension_numbers<[1], [0], [0], [1], [0, 0, 1, 1], [], []>} : vector<32x128xbf16>, vector<128x128xbf16>, vector<32x128xf32> -> vector<32x128xf32>
    %56 = arith.addf %50, %55 : vector<32x128xf32>
    %c0_31 = arith.constant 0 : index
    %c0_32 = arith.constant 0 : index
    %57 = vector.load %arg3[%c0_31, %c0_32] : memref<1x128xf32, #tpu.memory_space<vmem>>, vector<1x128xf32>
    %58 = vector.broadcast %57 : vector<1x128xf32> to vector<32x128xf32>
    %59 = arith.addf %56, %58 : vector<32x128xf32>
    %cst_33 = arith.constant 0.000000e+00 : f32
    %60 = vector.broadcast %cst_33 : f32 to vector<32x128xf32>
    %61 = arith.maximumf %59, %60 : vector<32x128xf32>
    %c0_34 = arith.constant 0 : index
    %c0_35 = arith.constant 0 : index
    %62 = vector.load %arg4[%c0_34, %c0_35] : memref<1x128xf32, #tpu.memory_space<vmem>>, vector<1x128xf32>
    %63 = vector.broadcast %62 : vector<1x128xf32> to vector<32x128xf32>
    %64 = arith.mulf %61, %63 : vector<32x128xf32>
    %cst_36 = arith.constant dense<0.000000e+00> : vector<32xf32>
    %65 = vector.multi_reduction <add>, %64, %cst_36 [1] : vector<32x128xf32> to vector<32xf32>
    %66 = vector.shape_cast %65 : vector<32xf32> to vector<32x1xf32>
    %c0_37 = arith.constant 0 : index
    %c0_38 = arith.constant 0 : index
    %67 = memref.load %arg5[%c0_37, %c0_38] : memref<1x1xf32, #tpu.memory_space<smem>>
    %68 = vector.broadcast %67 : f32 to vector<32x1xf32>
    %69 = arith.addf %66, %68 : vector<32x1xf32>
    %cst_39 = arith.constant 0.000000e+00 : f32
    %70 = vector.broadcast %cst_39 : f32 to vector<32x1xf32>
    %71 = arith.subf %70, %69 : vector<32x1xf32>
    %72 = math.exp %71 : vector<32x1xf32>
    %cst_40 = arith.constant 1.000000e+00 : f32
    %73 = vector.broadcast %cst_40 : f32 to vector<32x1xf32>
    %74 = arith.addf %73, %72 : vector<32x1xf32>
    %75 = tpu.reciprocal %74 {approx = true} : vector<32x1xf32> -> vector<32x1xf32>
    %76 = vector.extract_strided_slice %1 {offsets = [1, 1, 0], sizes = [4, 8, 128], strides = [1, 1, 1]} : vector<6x10x128xbf16> to vector<4x8x128xbf16>
    %77 = vector.shape_cast %76 : vector<4x8x128xbf16> to vector<32x128xbf16>
    %78 = arith.truncf %75 : vector<32x1xf32> to vector<32x1xbf16>
    %79 = vector.broadcast %78 : vector<32x1xbf16> to vector<32x128xbf16>
    %80 = arith.mulf %77, %79 : vector<32x128xbf16>
    %c0_41 = arith.constant 0 : index
    %c0_42 = arith.constant 0 : index
    %81 = vector.load %arg6[%c0_41, %c0_42] : memref<128x128xbf16, #tpu.memory_space<vmem>>, vector<128x128xbf16>
    %cst_43 = arith.constant dense<0.000000e+00> : vector<32x128xf32>
    %82 = tpu.matmul %80, %81, %cst_43 {dimension_numbers = #tpu.dot_dimension_numbers<[1], [0], [0], [1], [0, 0, 1, 1], [], []>} : vector<32x128xbf16>, vector<128x128xbf16>, vector<32x128xf32> -> vector<32x128xf32>
    %c0_44 = arith.constant 0 : index
    %c0_45 = arith.constant 0 : index
    %83 = vector.load %arg7[%c0_44, %c0_45] : memref<1x128xf32, #tpu.memory_space<vmem>>, vector<1x128xf32>
    %84 = vector.broadcast %83 : vector<1x128xf32> to vector<32x128xf32>
    %85 = arith.addf %82, %84 : vector<32x128xf32>
    %86 = arith.truncf %85 : vector<32x128xf32> to vector<32x128xbf16>
    %c0_46 = arith.constant 0 : index
    %c0_47 = arith.constant 0 : index
    %c0_48 = arith.constant 0 : index
    %87 = vector.load %arg8[%c0_46, %c0_47, %c0_48] : memref<1x32x128xbf16, #tpu.memory_space<vmem>>, vector<1x32x128xbf16>
    %88 = vector.shape_cast %87 : vector<1x32x128xbf16> to vector<32x128xbf16>
    %89 = vector.shape_cast %86 : vector<32x128xbf16> to vector<1x32x128xbf16>
    tpu.vector_store %arg8[%c0_46, %c0_47, %c0_48], %89 {strides = array<i32>} : memref<1x32x128xbf16, #tpu.memory_space<vmem>>, vector<1x32x128xbf16>,
    return
  }
  func.func @transform_0(%arg0: i32) -> (i32, i32, i32, i32) {
    %c0_i32 = arith.constant 0 : i32
    %c0_i32_0 = arith.constant 0 : i32
    %c0_i32_1 = arith.constant 0 : i32
    %c0_i32_2 = arith.constant 0 : i32
    return %arg0, %c0_i32, %c0_i32_0, %c0_i32_1 : i32, i32, i32, i32
  }
  func.func @transform_1(%arg0: i32) -> (i32, i32, i32) {
    %c0_i32 = arith.constant 0 : i32
    %c0_i32_0 = arith.constant 0 : i32
    %c0_i32_1 = arith.constant 0 : i32
    %c0_i32_2 = arith.constant 0 : i32
    return %c0_i32, %c0_i32_0, %c0_i32_1 : i32, i32, i32
  }
  func.func @transform_2(%arg0: i32) -> (i32, i32) {
    %c0_i32 = arith.constant 0 : i32
    %c0_i32_0 = arith.constant 0 : i32
    %c0_i32_1 = arith.constant 0 : i32
    return %c0_i32, %c0_i32_0 : i32, i32
  }
  func.func @transform_3(%arg0: i32) -> (i32, i32) {
    %c0_i32 = arith.constant 0 : i32
    %c0_i32_0 = arith.constant 0 : i32
    %c0_i32_1 = arith.constant 0 : i32
    return %c0_i32, %c0_i32_0 : i32, i32
  }
  func.func @transform_4(%arg0: i32) -> (i32, i32) {
    %c0_i32 = arith.constant 0 : i32
    %c0_i32_0 = arith.constant 0 : i32
    %c0_i32_1 = arith.constant 0 : i32
    return %c0_i32, %c0_i32_0 : i32, i32
  }
  func.func @transform_5(%arg0: i32) -> (i32, i32) {
    %c0_i32 = arith.constant 0 : i32
    %c0_i32_0 = arith.constant 0 : i32
    %c0_i32_1 = arith.constant 0 : i32
    return %c0_i32, %c0_i32_0 : i32, i32
  }
  func.func @transform_6(%arg0: i32) -> (i32, i32) {
    %c0_i32 = arith.constant 0 : i32
    %c0_i32_0 = arith.constant 0 : i32
    %c0_i32_1 = arith.constant 0 : i32
    return %c0_i32, %c0_i32_0 : i32, i32
  }
  func.func @transform_7(%arg0: i32) -> (i32, i32, i32) {
    %c0_i32 = arith.constant 0 : i32
    %c0_i32_0 = arith.constant 0 : i32
    %c0_i32_1 = arith.constant 0 : i32
    return %arg0, %c0_i32, %c0_i32_0 : i32, i32, i32
  }
}

</mosaic_0001>

<bundles_post_ra>
// kernel: east_forward.1
= control target key start
LH: loop header
LB: loop body
LE: loop exit
PB: predicated region body
PF: predicated region fallthrough
CT: control target
= control target key end

     0   :  { %s2126_s26 = smov 0   ;;  %s2547_s0 = inlined_call_operand.vmem [shape: bf16[4,6,10,128], index: 0, kind: input, shape index: {}]   ;;  %s2548_s1 = inlined_call_operand.vmem [shape: bf16[9,128,128], index: 1, kind: input, shape index: {}]   ;;  %s2549_s2 = inlined_call_operand.vmem [shape: f32[1,128], index: 2, kind: input, shape index: {}]   ;;  %s2550_s3 = inlined_call_operand.vmem [shape: f32[1,128], index: 3, kind: input, shape index: {}]   ;;  %s2551_s4 = inlined_call_operand.<no memory space> [shape: f32[1,1], index: 4, kind: input, shape index: {}]   ;;  %s2552_s5 = inlined_call_operand.vmem [shape: bf16[128,128], index: 5, kind: input, shape index: {}]   ;;  %s2553_s6 = inlined_call_operand.vmem [shape: f32[1,128], index: 6, kind: input, shape index: {}]   ;;  %s2554_s7 = inlined_call_operand.vmem [shape: bf16[4,32,128], index: 7, kind: output, shape index: {}]  }
   0x1   :  { %12 = sst [smem:[#allocation2]] %s2551_s4 }
   0x2 LB: > { %s1475_s27 = sadd.s32 4294967295, %s2081_s26   ;;  %p1479_p0 = scmp.ge.s32.totalorder %s2081_s26, 1  ;;  %s2081_s26 = sphi %s2126_s26, %s18_s26  }
   0x3   : > { %p238_p1 = scmp.lt.s32.totalorder %s2081_s26, 5 }
   0x5   : > { %p239_p2 = pnand %p1479_p0, %p238_p1 }
   0x6   : > { %p270_p3 = scmp.lt.s32.totalorder (!%p239_p2), %s1475_s27, 3  ;;  %s1281_s14 = sld [smem:[#allocation2]] (!%p239_p2) }
   0x7   : > { %242 = sbr.rel (%p239_p2) target bundleno = 548 (0x224), region = 48 }
   0xc   : > { %v1955_v0 = vld [vmem:[%s2548_s1 + $0x78] sm:$0xff]  ;;  %v1954_v4 = vld [vmem:[%s2548_s1 + $0x70] sm:$0xff]  ;;  %s2560_s27 = smov (!%p270_p3, %s1475_s27), 3  ;;  %v1953_v8 = vld [vmem:[%s2548_s1 + $0x68] sm:$0xff]  ;;  %vm542_vm0 = vcmask 1042432   ;;  %vm543_vm1 = vcmask 1046532  }
   0xd   : > { %v1963_v1 = vld [vmem:[%s2548_s1 + $0xb8] sm:$0xff]  ;;  %440 = vmatpush.bf16.msra.mxu0 %v1955_v0  ;;  %v1962_v5 = vld [vmem:[%s2548_s1 + $0xb0] sm:$0xff]  ;;  %s2047_s20 = smul.u32 48, %s2560_s27  ;;  %v1961_v9 = vld [vmem:[%s2548_s1 + $0xa8] sm:$0xff]  ;;  %vm308_vm2 = vsmask.f32 3328 }
   0xe   : > { %v1947_v2 = vld [vmem:[%s2548_s1 + $0x38] sm:$0xff]  ;;  %634 = vmatpush.bf16.msra.mxu2 %v1963_v1  ;;  %v1946_v6 = vld [vmem:[%s2548_s1 + $0x30] sm:$0xff]  ;;  %v1945_v10 = vld [vmem:[%s2548_s1 + $0x28] sm:$0xff]  ;;  %vm309_vm3 = vsmask.f32 7440  ;;  %s1939_s25 = sshll.u32 %s2560_s27, 4 }
   0xf   : > { %v1971_v3 = vld [vmem:[%s2548_s1 + $0xf8] sm:$0xff]  ;;  %519 = vmatpush.bf16.msra.mxu1 %v1947_v2  ;;  %v1970_v7 = vld [vmem:[%s2548_s1 + $0xf0] sm:$0xff]  ;;  %v1969_v11 = vld [vmem:[%s2548_s1 + $0xe8] sm:$0xff]  ;;  %s2176_s9 = scalar_lea.vmem %s2547_s0, %s2047_s20  ;;  %s279_s4 = scalar_lea.vmem %s2554_s7, %s1939_s25 }
  0x10   : > { %728 = vmatpush.bf16.msra.mxu3 %v1971_v3  ;;  %v1952_v12 = vld [vmem:[%s2548_s1 + $0x60] sm:$0xff]  ;;  %v2195_v18 = vld [vmem:[%s2176_s9 + $0x8] sm:$0xf]  ;;  %v283_v19 = vld [vmem:[%s2176_s9 + $0xc] sm:$0x1] }
  0x11   : > { %441 = vmatpush.bf16.msra.mxu0 %v1954_v4  ;;  %v1960_v13 = vld [vmem:[%s2548_s1 + $0xa0] sm:$0xff]  ;;  %v326_v22 = vshrl.u32 %v2195_v18, 16  ;;  %v329_v24 = vshll.u32 %v2195_v18, 16  ;;  %v1951_v25 = vld [vmem:[%s2548_s1 + $0x58] sm:$0xff]  ;;  %v335_v30 = vshll.u32 %v283_v19, 16  ;;  %v1950_v36 = vld [vmem:[%s2548_s1 + $0x50] sm:$0xff] }
  0x12   : > { %635 = vmatpush.bf16.msra.mxu2 %v1962_v5  ;;  %v1944_v14 = vld [vmem:[%s2548_s1 + $0x20] sm:$0xff]  ;;  %v1959_v26 = vld [vmem:[%s2548_s1 + $0x98] sm:$0xff]  ;;  %v1564_v39 = vrot.slane %v2195_v18, 9  ;;  %v551_v40 = vrot.slane %v283_v19, 5  ;;  %v1958_v41 = vld [vmem:[%s2548_s1 + $0x90] sm:$0xff] }
  0x13   : > { %520 = vmatpush.bf16.msra.mxu1 %v1946_v6  ;;  %v1968_v15 = vld [vmem:[%s2548_s1 + $0xe0] sm:$0xff]  ;;  %v328_v29 = vrot.slane %v326_v22, 4  ;;  %v1943_v31 = vld [vmem:[%s2548_s1 + $0x18] sm:$0xff]  ;;  %v331_v33 = vrot.slane %v329_v24, 5  ;;  %v1942_v42 = vld [vmem:[%s2548_s1 + $0x10] sm:$0xff]  ;;  %v337_v45 = vrot.slane %v335_v30, 5 }
  0x14   : > { %729 = vmatpush.bf16.msra.mxu3 %v1970_v7  ;;  %v2191_v16 = vld [vmem:[%s2176_s9] sm:$0xf]  ;;  %v281_v17 = vld [vmem:[%s2176_s9 + $0x4] sm:$0x1]  ;;  %v1967_v32 = vld [vmem:[%s2548_s1 + $0xd8] sm:$0xff] }
  0x15   : > { %442 = vmatpush.bf16.msra.mxu0 %v1953_v8  ;;  %v312_v20 = vshrl.u32 %v2191_v16, 16  ;;  %v315_v21 = vshll.u32 %v2191_v16, 16  ;;  %v321_v23 = vshll.u32 %v281_v17, 16  ;;  %v1563_v35 = vrot.slane %v2191_v16, 9  ;;  %vm2227_vm4 = vmor %vm542_vm0, %vm543_vm1  ;;  %v1966_v47 = vld [vmem:[%s2548_s1 + $0xd0] sm:$0xff]  ;;  %v1949_v56 = vld [vmem:[%s2548_s1 + $0x48] sm:$0xff] }
  0x16   : > { %636 = vmatpush.bf16.msra.mxu2 %v1961_v9  ;;  %v332_v37 = vor.u32 %v331_v33, %v328_v29  ;;  %v547_v38 = vrot.slane %v281_v17, 5  ;;  %vm2236_vm5 = vmor %vm308_vm2, %vm309_vm3  ;;  %v2241_v50 = vld [vmem:[%s2176_s9 + $0x18] sm:$0xf]  ;;  %v2244_v51 = vld [vmem:[%s2176_s9 + $0x10] sm:$0xf]  ;;  %v2250_v53 = vsel %vm2227_vm4, %v1564_v39, %v551_v40  ;;  %v463_v4 = vunpack.c.l.b16 %v2191_v16 }
  0x17   : > { %521 = vmatpush.bf16.msra.mxu1 %v1945_v10  ;;  %v314_v27 = vrot.slane %v312_v20, 4  ;;  %v317_v28 = vrot.slane %v315_v21, 5  ;;  %v323_v44 = vrot.slane %v321_v23, 5  ;;  %v340_v54 = vshrl.u32 %v2244_v51, 16  ;;  %v1957_v57 = vld [vmem:[%s2548_s1 + $0x88] sm:$0xff]  ;;  %v1948_v0 = vld [vmem:[%s2548_s1 + $0x40] sm:$0xff] }
  0x18   : > { %730 = vmatpush.bf16.msra.mxu3 %v1969_v11  ;;  %v333_v49 = vrot.slane %v332_v37, 4  ;;  %v548_v52 = vsel %vm2227_vm4, %v1563_v35, %v547_v38  ;;  %v343_v55 = vshll.u32 %v2244_v51, 16  ;;  %v354_v60 = vshrl.u32 %v2241_v50, 16  ;;  %v1941_v62 = vld [vmem:[%s2548_s1 + $0x8] sm:$0xff]  ;;  %v1956_v1 = vld [vmem:[%s2548_s1 + $0x80] sm:$0xff]  ;;  %v1995_v17 = vld [vmem:[%s2548_s1 + $0x1b8] sm:$0xff] }
  0x19   : > { %443 = vmatpush.bf16.msra.mxu0 %v1952_v12  ;;  %v318_v34 = vor.u32 %v317_v28, %v314_v27  ;;  %v357_v61 = vshll.u32 %v2241_v50, 16  ;;  %v1965_v63 = vld [vmem:[%s2548_s1 + $0xc8] sm:$0xff]  ;;  %v578_v2 = vunpack.c.l.b16 %v548_v52  ;;  %v579_v3 = vunpack.c.l.b16 %v2250_v53  ;;  %v285_v11 = vld [vmem:[%s2176_s9 + $0x14] sm:$0x1]  ;;  %v287_v16 = vld [vmem:[%s2176_s9 + $0x1c] sm:$0x1] }
  0x1a   : > { %637 = vmatpush.bf16.msra.mxu2 %v1960_v13  ;;  %v2264_v59 = vsel %vm2236_vm5, %v333_v49, %v337_v45  ;;  %v342_v7 = vrot.slane %v340_v54, 4  ;;  %v345_v8 = vrot.slane %v343_v55, 5  ;;  %v464_v9 = vunpack.c.l.b16 %v2195_v18  ;;  %v1979_v18 = vld [vmem:[%s2548_s1 + $0x138] sm:$0xff]  ;;  %v1994_v29 = vld [vmem:[%s2548_s1 + $0x1b0] sm:$0xff]  ;;  %v1985_v49 = vld [vmem:[%s2548_s1 + $0x168] sm:$0xff] }
  0x1b   : > { %522 = vmatpush.bf16.msra.mxu1 %v1944_v14  ;;  %v319_v43 = vrot.slane %v318_v34, 4  ;;  %v385_v6 = vunpack.c.l.b16 %v2264_v59  ;;  %v465_v10 = vunpack.c.l.b16 %v2244_v51  ;;  %v356_v12 = vrot.slane %v354_v60, 4  ;;  %v1940_v14 = vld [vmem:[%s2548_s1] sm:$0xff]  ;;  %v1987_v27 = vld [vmem:[%s2548_s1 + $0x178] sm:$0xff]  ;;  %v1978_v30 = vld [vmem:[%s2548_s1 + $0x130] sm:$0xff] }
  0x1c   : > { %731 = vmatpush.bf16.msra.mxu3 %v1968_v15  ;;  %v359_v13 = vrot.slane %v357_v61, 5  ;;  %v1964_v15 = vld [vmem:[%s2548_s1 + $0xc0] sm:$0xff]  ;;  %v582_v20 = vpack.c.b16 %v579_v3, %v578_v2  ;;  %v346_v21 = vor.u32 %v345_v8, %v342_v7  ;;  %v349_v22 = vshll.u32 %v285_v11, 16  ;;  %v2003_v28 = vld [vmem:[%s2548_s1 + $0x1f8] sm:$0xff]  ;;  %v1986_v39 = vld [vmem:[%s2548_s1 + $0x170] sm:$0xff] }
  0x1d   : > { %444 = vmatpush.bf16.msra.mxu0 %v1951_v25  ;;  %v324_v58 = vsel %vm2236_vm5, %v319_v43, %v323_v44  ;;  %v467_v23 = vpack.c.b16 %v464_v9, %v463_v4  ;;  %v676_v24 = vpack.c.b16 %v465_v10, %v464_v9  ;;  %v1565_v33 = vrot.slane %v2244_v51, 9  ;;  %v2002_v40 = vld [vmem:[%s2548_s1 + $0x1f0] sm:$0xff]  ;;  %v2001_v52 = vld [vmem:[%s2548_s1 + $0x1e8] sm:$0xff]  ;;  %v2354_v54 = vld [vmem:[%s2176_s9 + $0x20] sm:$0xf] }
  0x1e   : > { %638 = vmatpush.bf16.msra.mxu2 %v1959_v26  ;;  %v384_v5 = vunpack.c.l.b16 %v324_v58  ;;  %v360_v25 = vor.u32 %v359_v13, %v356_v12  ;;  %v363_v26 = vshll.u32 %v287_v16, 16  ;;  %v555_v34 = vrot.slane %v285_v11, 5  ;;  %v1992_v55 = vld [vmem:[%s2548_s1 + $0x1a0] sm:$0xff]  ;;  %v1991_v2 = vld [vmem:[%s2548_s1 + $0x198] sm:$0xff]  ;;  %v1990_v51 = vld [vmem:[%s2548_s1 + $0x190] sm:$0xff] }
  0x1f   : > { %523 = vmatpush.bf16.msra.mxu1 %v1943_v31  ;;  %v347_v31 = vrot.slane %v346_v21, 4  ;;  %v1566_v37 = vrot.slane %v2241_v50, 9  ;;  %v559_v38 = vrot.slane %v287_v16, 5  ;;  %v1983_v9 = vld [vmem:[%s2548_s1 + $0x158] sm:$0xff]  ;;  %v1982_v12 = vld [vmem:[%s2548_s1 + $0x150] sm:$0xff] }
  0x20   : > { %732 = vmatpush.bf16.msra.mxu3 %v1967_v32  ;;  %v388_v19 = vpack.c.b16 %v385_v6, %v384_v5  ;;  %v351_v32 = vrot.slane %v349_v22, 5  ;;  %v361_v35 = vrot.slane %v360_v25, 4  ;;  %v2341_v45 = vsel %vm2227_vm4, %v1565_v33, %v555_v34  ;;  %v1999_v11 = vld [vmem:[%s2548_s1 + $0x1d8] sm:$0xff]  ;;  %v1998_v13 = vld [vmem:[%s2548_s1 + $0x1d0] sm:$0xff]  ;;  %v2423_v16 = vld [vmem:[%s2176_s9 + $0x28] sm:$0xf] }
  0x21   : > { %445 = vmatpush.bf16.msra.mxu0 %v1950_v36  ;;  %v365_v36 = vrot.slane %v363_v26, 5  ;;  %v580_v60 = vunpack.c.l.b16 %v2341_v45  ;;  %v1053_v21 = vshrl.u32 %v2423_v16, 16  ;;  %v1056_v22 = vshll.u32 %v2423_v16, 16  ;;  %v2011_v25 = vld [vmem:[%s2548_s1 + $0x238] sm:$0xff]  ;;  %v291_v33 = vld [vmem:[%s2176_s9 + $0x2c] sm:$0x1] }
  0x22   : > { %639 = vmatpush.bf16.msra.mxu2 %v1958_v41  ;;  %v1993_v41 = vld [vmem:[%s2548_s1 + $0x1a8] sm:$0xff]  ;;  %v2333_v43 = vsel %vm2236_vm5, %v347_v31, %v351_v32 }
  0x23   : > { %524 = vmatpush.bf16.msra.mxu1 %v1942_v42  ;;  %v1977_v42 = vld [vmem:[%s2548_s1 + $0x128] sm:$0xff]  ;;  %v2337_v44 = vsel %vm2236_vm5, %v361_v35, %v365_v36  ;;  %v1055_v31 = vrot.slane %v1053_v21, 4  ;;  %v1058_v32 = vrot.slane %v1056_v22, 5  ;;  %v885_v35 = vpack.c.b16 %v580_v60, %v579_v3 }
  0x24   : > { %733 = vmatpush.bf16.msra.mxu3 %v1966_v47  ;;  %v2345_v47 = vsel %vm2227_vm4, %v1566_v37, %v559_v38  ;;  %v387_v58 = vunpack.c.l.b16 %v2337_v44  ;;  %v2010_v38 = vld [vmem:[%s2548_s1 + $0x230] sm:$0xff]  ;;  %v2009_v3 = vld [vmem:[%s2548_s1 + $0x228] sm:$0xff] }
  0x25   : > { %446 = vmatpush.bf16.msra.mxu0 %v1949_v56  ;;  %v1976_v56 = vld [vmem:[%s2548_s1 + $0x120] sm:$0xff]  ;;  %v581_v61 = vunpack.c.l.b16 %v2345_v47  ;;  %v2005_v47 = vld [vmem:[%s2548_s1 + $0x208] sm:$0xff] }
  0x26   : > { %640 = vmatpush.bf16.msra.mxu2 %v1957_v57  ;;  %v386_v57 = vunpack.c.l.b16 %v2333_v43 }
  0x27   : > { %525 = vmatpush.bf16.msra.mxu1 %v1941_v62  ;;  %v466_v62 = vunpack.c.l.b16 %v2241_v50  ;;  %v1975_v50 = vld [vmem:[%s2548_s1 + $0x118] sm:$0xff]  ;;  %v2390_v5 = vpack.c.b16 %v581_v61, %v580_v60 }
  0x28   : > { %734 = vmatpush.bf16.msra.mxu3 %v1965_v63  ;;  %v675_v63 = vunpack.c.l.b16 %v2354_v54  ;;  %v2384_v4 = vpack.c.b16 %v387_v58, %v386_v57  ;;  %v787_v34 = vpack.c.b16 %v386_v57, %v385_v6 }
  0x29   : > { %447 = vmatpush.bf16.msra.mxu0 %v1948_v0  ;;  %v1984_v0 = vld [vmem:[%s2548_s1 + $0x160] sm:$0xff]  ;;  %v468_v7 = vpack.c.b16 %v466_v62, %v465_v10  ;;  %v1974_v10 = vld [vmem:[%s2548_s1 + $0x110] sm:$0xff] }
  0x2a   : > { %641 = vmatpush.bf16.msra.mxu2 %v1956_v1  ;;  %v2000_v1 = vld [vmem:[%s2548_s1 + $0x1e0] sm:$0xff]  ;;  %v677_v8 = vpack.c.b16 %v675_v63, %v466_v62  ;;  %v978_v62 = vunpack.c.l.b16 %v2423_v16 }
  0x2b   : > { %526 = vmatpush.bf16.msra.mxu1 %v1940_v14  ;;  %v1989_v14 = vld [vmem:[%s2548_s1 + $0x188] sm:$0xff] }
  0x2c   : > { %735 = vmatpush.bf16.msra.mxu3 %v1964_v15  ;;  %448 = vmatmul.bf16.vlgmr.msra.gmra.mxu0 %v388_v19  ;;  %v1973_v15 = vld [vmem:[%s2548_s1 + $0x108] sm:$0xff] }
  0x2d   : > { %839 = vmatpush.bf16.msrb.mxu0 %v1979_v18  ;;  %642 = vmatmul.bf16.vlgmr.msra.gmra.mxu2 %v582_v20  ;;  %v755_v18 = vshll.u32 %v2354_v54, 16  ;;  %v1981_v19 = vld [vmem:[%s2548_s1 + $0x148] sm:$0xff] }
  0x2e   : > { %1029 = vmatpush.bf16.msrb.mxu2 %v1995_v17  ;;  %527 = vmatmul.bf16.vlgmr.msra.gmra.mxu1 %v467_v23  ;;  %v752_v17 = vshrl.u32 %v2354_v54, 16  ;;  %v1997_v20 = vld [vmem:[%s2548_s1 + $0x1c8] sm:$0xff]  ;;  %v1988_v23 = vld [vmem:[%s2548_s1 + $0x180] sm:$0xff] }
  0x2f   : > { %736 = vmatmul.bf16.vlgmr.msra.gmra.mxu3 %v676_v24  ;;  %937 = vmatpush.bf16.msrb.mxu1 %v1987_v27  ;;  %v1972_v24 = vld [vmem:[%s2548_s1 + $0x100] sm:$0xff]  ;;  %v757_v27 = vrot.slane %v755_v18, 5 }
  0x30   : > { %1134 = vmatpush.bf16.msrb.mxu3 %v2003_v28  ;;  %v754_v26 = vrot.slane %v752_v17, 4  ;;  %v1980_v28 = vld [vmem:[%s2548_s1 + $0x140] sm:$0xff] }
  0x31   : > { %840 = vmatpush.bf16.msrb.mxu0 %v1978_v30  ;;  %v289_v30 = vld [vmem:[%s2176_s9 + $0x24] sm:$0x1] }
  0x32   : > { %1030 = vmatpush.bf16.msrb.mxu2 %v1994_v29  ;;  %v1996_v29 = vld [vmem:[%s2548_s1 + $0x1c0] sm:$0xff]  ;;  %v758_v36 = vor.u32 %v757_v27, %v754_v26  ;;  %v761_v37 = vshll.u32 %v289_v30, 16 }
  0x33   : > { %938 = vmatpush.bf16.msrb.mxu1 %v1986_v39  ;;  %v1059_v39 = vor.u32 %v1058_v32, %v1055_v31 }
  0x34   : > { %1135 = vmatpush.bf16.msrb.mxu3 %v2002_v40  ;;  %v1062_v40 = vshll.u32 %v291_v33, 16  ;;  %v759_v6 = vrot.slane %v758_v36, 4  ;;  %v763_v53 = vrot.slane %v761_v37, 5 }
  0x35   : > { %841 = vmatpush.bf16.msrb.mxu0 %v1977_v42  ;;  %v865_v42 = vrot.slane %v289_v30, 5  ;;  %v1060_v45 = vrot.slane %v1059_v39, 4 }
  0x36   : > { %1031 = vmatpush.bf16.msrb.mxu2 %v1993_v41  ;;  %v1711_v41 = vrot.slane %v2354_v54, 9 }
  0x37   : > { %939 = vmatpush.bf16.msrb.mxu1 %v1985_v49  ;;  %v1064_v49 = vrot.slane %v1062_v40, 5 }
  0x38   : > { %1136 = vmatpush.bf16.msrb.mxu3 %v2001_v52  ;;  %v2470_v52 = vsel %vm2236_vm5, %v759_v6, %v763_v53 }
  0x39   : > { %842 = vmatpush.bf16.msrb.mxu0 %v1976_v56  ;;  %v866_v56 = vsel %vm2227_vm4, %v1711_v41, %v865_v42  ;;  %v1065_v57 = vsel %vm2236_vm5, %v1060_v45, %v1064_v49  ;;  %v786_v60 = vunpack.c.l.b16 %v2470_v52 }
  0x3a   : > { %1032 = vmatpush.bf16.msrb.mxu2 %v1992_v55  ;;  %v2008_v55 = vld [vmem:[%s2548_s1 + $0x220] sm:$0xff] }
  0x3b   : > { %940 = vmatpush.bf16.msrb.mxu1 %v1984_v0  ;;  %v884_v0 = vunpack.c.l.b16 %v866_v56 }
  0x3c   : > { %1137 = vmatpush.bf16.msrb.mxu3 %v2000_v1  ;;  %453 = vmatmul.bf16.gmra.mxu0 %v2384_v4  ;;  %v1083_v1 = vunpack.c.l.b16 %v1065_v57 }
  0x3d   : > { %843 = vmatpush.bf16.msrb.mxu0 %v1975_v50  ;;  %647 = vmatmul.bf16.gmra.mxu2 %v2390_v5  ;;  %v788_v50 = vpack.c.b16 %v786_v60, %v387_v58  ;;  %v886_v48 = vpack.c.b16 %v884_v0, %v581_v61  ;;  %v2004_v58 = vld [vmem:[%s2548_s1 + $0x200] sm:$0xff] }
  0x3e   : > { %1033 = vmatpush.bf16.msrb.mxu2 %v1991_v2  ;;  %532 = vmatmul.bf16.gmra.mxu1 %v468_v7  ;;  %v2007_v2 = vld [vmem:[%s2548_s1 + $0x218] sm:$0xff] }
  0x3f   : > { %741 = vmatmul.bf16.gmra.mxu3 %v677_v8  ;;  %941 = vmatpush.bf16.msrb.mxu1 %v1983_v9  ;;  %v2006_v8 = vld [vmem:[%s2548_s1 + $0x210] sm:$0xff]  ;;  %v1856_v9 = vrot.slane %v2423_v16, 9 }
  0x40   : > { %1138 = vmatpush.bf16.msrb.mxu3 %v1999_v11  ;;  %v1160_v11 = vrot.slane %v291_v33, 5 }
  0x41   : > { %844 = vmatpush.bf16.msrb.mxu0 %v1974_v10 }
  0x42   : > { %1034 = vmatpush.bf16.msrb.mxu2 %v1990_v51  ;;  %v1161_v54 = vsel %vm2227_vm4, %v1856_v9, %v1160_v11 }
  0x43   : > { %942 = vmatpush.bf16.msrb.mxu1 %v1982_v12  ;;  %v1179_v61 = vunpack.c.l.b16 %v1161_v54 }
  0x44   : > { %1139 = vmatpush.bf16.msrb.mxu3 %v1998_v13 }
  0x45   : > { %845 = vmatpush.bf16.msrb.mxu0 %v1973_v15 }
  0x46   : > { %1035 = vmatpush.bf16.msrb.mxu2 %v1989_v14 }
  0x47   : > { %943 = vmatpush.bf16.msrb.mxu1 %v1981_v19 }
  0x48   : > { %1140 = vmatpush.bf16.msrb.mxu3 %v1997_v20 }
  0x49   : > { %846 = vmatpush.bf16.msrb.mxu0 %v1972_v24 }
  0x4a   : > { %1036 = vmatpush.bf16.msrb.mxu2 %v1988_v23 }
  0x4b   : > { %944 = vmatpush.bf16.msrb.mxu1 %v1980_v28 }
  0x4c   : > { %1141 = vmatpush.bf16.msrb.mxu3 %v1996_v29  ;;  %847 = vmatmul.bf16.vlgmr.msrb.gmra.mxu0 %v787_v34 }
  0x4d   : > { %1230 = vmatpush.bf16.msra.mxu0 %v2011_v25  ;;  %1037 = vmatmul.bf16.vlgmr.msrb.gmra.mxu2 %v468_v7  ;;  %v1084_v7 = vpack.c.b16 %v1083_v1, %v786_v60 }
  0x4e   : > { %2031 = vmatpush.bf16.msra.mxu2 %v2011_v25  ;;  %945 = vmatmul.bf16.vlgmr.msrb.gmra.mxu1 %v885_v35 }
  0x4f   : > { %1142 = vmatmul.bf16.vlgmr.msrb.gmra.mxu3 %v2384_v4  ;;  %v979_v4 = vpack.c.b16 %v978_v62, %v675_v63  ;;  %v1180_v63 = vpack.c.b16 %v1179_v61, %v884_v0 }
  0x51   : > { %1231 = vmatpush.bf16.msra.mxu0 %v2010_v38 }
  0x52   : > { %2032 = vmatpush.bf16.msra.mxu2 %v2010_v38 }
  0x55   : > { %1232 = vmatpush.bf16.msra.mxu0 %v2009_v3 }
  0x56   : > { %2033 = vmatpush.bf16.msra.mxu2 %v2009_v3 }
  0x59   : > { %1233 = vmatpush.bf16.msra.mxu0 %v2008_v55 }
  0x5a   : > { %2034 = vmatpush.bf16.msra.mxu2 %v2008_v55 }
  0x5c   : > { %852 = vmatmul.bf16.gmra.mxu0 %v788_v50 }
  0x5d   : > { %1234 = vmatpush.bf16.msra.mxu0 %v2007_v2  ;;  %1042 = vmatmul.bf16.gmra.mxu2 %v979_v4 }
  0x5e   : > { %2035 = vmatpush.bf16.msra.mxu2 %v2007_v2  ;;  %950 = vmatmul.bf16.gmra.mxu1 %v886_v48  ;;  %v2056_v2 = vld [vmem:[%s2549_s2] ss:$0 sm:$0xff] }
  0x5f   : > { %1147 = vmatmul.bf16.gmra.mxu3 %v1084_v7 }
  0x61   : > { %1235 = vmatpush.bf16.msra.mxu0 %v2006_v8 }
  0x62   : > { %2036 = vmatpush.bf16.msra.mxu2 %v2006_v8 }
  0x65   : > { %1236 = vmatpush.bf16.msra.mxu0 %v2005_v47 }
  0x66   : > { %2037 = vmatpush.bf16.msra.mxu2 %v2005_v47 }
  0x69   : > { %1237 = vmatpush.bf16.msra.mxu0 %v2004_v58 }
  0x6a   : > { %2038 = vmatpush.bf16.msra.mxu2 %v2004_v58  ;;  %v2057_v58 = vld [vmem:[%s2550_s3] ss:$0 sm:$0xff] }
  0x6c   : > { %1238 = vmatmul.bf16.vlgmr.msra.gmra.mxu0 %v2390_v5 }
  0x6d   : > { %1243 = vmatmul.bf16.vlgmr.msra.gmra.mxu2 %v1180_v63 }
  0xa9   : > { %v449_v51 = vpop.f32.mrf.mxu0 }
  0xab   : > { %v528_v10 = vpop.f32.mrf.mxu1 }
  0xac   : > { %v529_v28 = vadd.f32 %v528_v10, %v449_v51 }
  0xb0   : > { %v643_v12 = vpop.f32.mrf.mxu2 }
  0xb1   : > { %v451_v14 = vpop.f32.mrf.mxu0  ;;  %v653_v31 = vadd.f32 %v643_v12, %v529_v28 }
  0xb2   : > { %v737_v13 = vpop.f32.mrf.mxu3 }
  0xb3   : > { %v530_v46 = vpop.f32.mrf.mxu1  ;;  %v747_v35 = vadd.f32 %v737_v13, %v653_v31  ;;  %v2018_v31 = vld [vmem:[%s2552_s5 + $0x30] sm:$0xff] }
  0xb4   : > { %v531_v36 = vadd.f32 %v530_v46, %v451_v14 }
  0xb8   : > { %v645_v15 = vpop.f32.mrf.mxu2 }
  0xb9   : > { %v454_v17 = vpop.f32.mrf.mxu0  ;;  %v654_v6 = vadd.f32 %v645_v15, %v531_v36  ;;  %v1282_v36 = vstv %s1281_s14 }
  0xba   : > { %v739_v16 = vpop.f32.mrf.mxu3 }
  0xbb   : > { %v533_v18 = vpop.f32.mrf.mxu1  ;;  %v748_v49 = vadd.f32 %v739_v16, %v654_v6 }
  0xbc   : > { %v534_v34 = vadd.f32 %v533_v18, %v454_v17 }
  0xc0   : > { %v648_v19 = vpop.f32.mrf.mxu2 }
  0xc1   : > { %v456_v20 = vpop.f32.mrf.mxu0  ;;  %v655_v37 = vadd.f32 %v648_v19, %v534_v34  ;;  %v2015_v34 = vld [vmem:[%s2552_s5 + $0x18] sm:$0xff] }
  0xc2   : > { %v742_v21 = vpop.f32.mrf.mxu3 }
  0xc3   : > { %v535_v22 = vpop.f32.mrf.mxu1  ;;  %v749_v3 = vadd.f32 %v742_v21, %v655_v37  ;;  %v2013_v37 = vld [vmem:[%s2552_s5 + $0x8] sm:$0xff] }
  0xc4   : > { %v536_v41 = vadd.f32 %v535_v22, %v456_v20 }
  0xc8   : > { %v650_v23 = vpop.f32.mrf.mxu2 }
  0xc9   : > { %v848_v24 = vpop.f32.mrf.mxu0  ;;  %v656_v57 = vadd.f32 %v650_v23, %v536_v41 }
  0xca   : > { %v744_v25 = vpop.f32.mrf.mxu3  ;;  %v858_v38 = vadd.f32 %v848_v24, %v747_v35  ;;  %v2014_v35 = vld [vmem:[%s2552_s5 + $0x10] sm:$0xff] }
  0xcb   : > { %v946_v26 = vpop.f32.mrf.mxu1  ;;  %v750_v48 = vadd.f32 %v744_v25, %v656_v57 }
  0xcc   : > { %v956_v42 = vadd.f32 %v946_v26, %v858_v38 }
  0xd0   : > { %v1038_v5 = vpop.f32.mrf.mxu2 }
  0xd1   : > { %v850_v27 = vpop.f32.mrf.mxu0  ;;  %v1048_v55 = vadd.f32 %v1038_v5, %v956_v42 }
  0xd2   : > { %v1143_v29 = vpop.f32.mrf.mxu3  ;;  %v859_v60 = vadd.f32 %v850_v27, %v748_v49 }
  0xd3   : > { %v948_v32 = vpop.f32.mrf.mxu1  ;;  %v1153_v0 = vadd.f32 %v1143_v29, %v1048_v55 }
  0xd4   : > { %v957_v7 = vadd.f32 %v948_v32, %v859_v60  ;;  %v2017_v32 = vld [vmem:[%s2552_s5 + $0x28] sm:$0xff] }
  0xd8   : > { %v1040_v30 = vpop.f32.mrf.mxu2 }
  0xd9   : > { %v853_v33 = vpop.f32.mrf.mxu0  ;;  %v1049_v11 = vadd.f32 %v1040_v30, %v957_v7  ;;  %v2019_v30 = vld [vmem:[%s2552_s5 + $0x38] sm:$0xff] }
  0xda   : > { %v1145_v39 = vpop.f32.mrf.mxu3  ;;  %v860_v56 = vadd.f32 %v853_v33, %v749_v3  ;;  %1393 = vmatpush.bf16.msra.mxu1 %v2019_v30  ;;  %2039 = vmatpush.bf16.msra.mxu3 %v2019_v30  ;;  %v2016_v33 = vld [vmem:[%s2552_s5 + $0x20] sm:$0xff] }
  0xdb   : > { %v951_v45 = vpop.f32.mrf.mxu1  ;;  %v1154_v12 = vadd.f32 %v1145_v39, %v1049_v11 }
  0xdc   : > { %v958_v1 = vadd.f32 %v951_v45, %v860_v56 }
  0xde   : > { %1394 = vmatpush.bf16.msra.mxu1 %v2018_v31  ;;  %2040 = vmatpush.bf16.msra.mxu3 %v2018_v31 }
  0xe0   : > { %v1043_v40 = vpop.f32.mrf.mxu2 }
  0xe1   : > { %v855_v53 = vpop.f32.mrf.mxu0  ;;  %v1050_v8 = vadd.f32 %v1043_v40, %v958_v1  ;;  %v2012_v40 = vld [vmem:[%s2552_s5] sm:$0xff] }
  0xe2   : > { %v1148_v50 = vpop.f32.mrf.mxu3  ;;  %v861_v47 = vadd.f32 %v855_v53, %v750_v48  ;;  %1395 = vmatpush.bf16.msra.mxu1 %v2017_v32  ;;  %2041 = vmatpush.bf16.msra.mxu3 %v2017_v32 }
  0xe3   : > { %v953_v61 = vpop.f32.mrf.mxu1  ;;  %v1155_v63 = vadd.f32 %v1148_v50, %v1050_v8 }
  0xe4   : > { %v959_v13 = vadd.f32 %v953_v61, %v861_v47 }
  0xe6   : > { %1396 = vmatpush.bf16.msra.mxu1 %v2016_v33  ;;  %2042 = vmatpush.bf16.msra.mxu3 %v2016_v33 }
  0xe8   : > { %v1045_v62 = vpop.f32.mrf.mxu2 }
  0xe9   : > { %v1239_v4 = vpop.f32.mrf.mxu0  ;;  %v1051_v16 = vadd.f32 %v1045_v62, %v959_v13 }
  0xea   : > { %v1249_v9 = vadd.f32 %v1239_v4, %v1153_v0  ;;  %v1150_v19 = vpop.f32.mrf.mxu3  ;;  %1397 = vmatpush.bf16.msra.mxu1 %v2015_v34  ;;  %2043 = vmatpush.bf16.msra.mxu3 %v2015_v34 }
  0xeb   : > { %v1156_v22 = vadd.f32 %v1150_v19, %v1051_v16 }
  0xec   : > { %v1257_v54 = vadd.f32 %v2056_v2, %v1249_v9 }
  0xee   : > { %v1261_v51 = vmax.f32 %v1257_v54, 0.0  ;;  %1398 = vmatpush.bf16.msra.mxu1 %v2014_v35  ;;  %2044 = vmatpush.bf16.msra.mxu3 %v2014_v35 }
  0xf0   : > { %v1244_v10 = vpop.f32.mrf.mxu2  ;;  %v1269_v46 = vmul.f32 %v2057_v58, %v1261_v51  ;;  %v1312_v51 = vunpack.c.l.bf16 %v2333_v43 }
  0xf1   : > { %v1251_v14 = vadd.f32 %v1244_v10, %v1155_v63  ;;  %v1241_v15 = vpop.f32.mrf.mxu0  ;;  %v1311_v63 = vunpack.c.l.bf16 %v2264_v59 }
  0xf2   : > { %v1250_v17 = vadd.f32 %v1241_v15, %v1154_v12  ;;  %1273 = vadd.xlane.f32.xlu1 %v1269_v46  ;;  %1399 = vmatpush.bf16.msra.mxu1 %v2013_v37 }
  0xf3   : > { %v1259_v18 = vadd.f32 %v2056_v2, %v1251_v14  ;;  %2045 = vmatpush.bf16.msra.mxu3 %v2013_v37 }
  0xf4   : > { %v1258_v20 = vadd.f32 %v2056_v2, %v1250_v17  ;;  %v1313_v17 = vunpack.c.l.bf16 %v2337_v44 }
  0xf5   : > { %v1263_v21 = vmax.f32 %v1259_v18, 0.0  ;;  %v1314_v18 = vunpack.c.l.bf16 %v2470_v52 }
  0xf6   : > { %v1262_v23 = vmax.f32 %v1258_v20, 0.0  ;;  %1400 = vmatpush.bf16.msra.mxu1 %v2012_v40 }
  0xf7   : > { %v1271_v24 = vmul.f32 %v2057_v58, %v1263_v21  ;;  %2046 = vmatpush.bf16.msra.mxu3 %v2012_v40 }
  0xf8   : > { %v1246_v25 = vpop.f32.mrf.mxu2  ;;  %v1270_v5 = vmul.f32 %v2057_v58, %v1262_v23 }
  0xf9   : > { %v1252_v26 = vadd.f32 %v1246_v25, %v1156_v22  ;;  %1277 = vadd.xlane.f32.xlu0 %v1271_v24  ;;  %v2058_v25 = vld [vmem:[%s2553_s6] ss:$0 sm:$0xff] }
  0xfa   : > { %1275 = vadd.xlane.f32.xlu1 %v1270_v5 }
  0xfb   : > { %v1260_v27 = vadd.f32 %v2056_v2, %v1252_v26 }
  0xfd   : > { %v1264_v28 = vmax.f32 %v1260_v27, 0.0 }
  0xff   : > { %v1272_v29 = vmul.f32 %v2057_v58, %v1264_v28 }
 0x101   : > { %1279 = vadd.xlane.f32.xlu0 %v1272_v29 }
 0x165   : > { %v1274_v38 = vpop.xlane.xlu1 %1273 }
 0x166   : > { %v1283_v39 = vadd.f32 %v1282_v36, %v1274_v38 }
 0x168   : > { %v1287_v6 = vsub.f32 0.0, %v1283_v39 }
 0x16a   : > { %v1291_v53 = vmul.f32 1.442695, %v1287_v6 }
 0x16c   : > { %v1278_v3 = vpop.xlane.xlu0 %1277  ;;  %2059 = vpow2.f32 %v1291_v53 }
 0x16d   : > { %v1285_v41 = vadd.f32 %v1282_v36, %v1278_v3  ;;  %v1276_v42 = vpop.xlane.xlu1 %1275 }
 0x16e   : > { %v1284_v49 = vadd.f32 %v1282_v36, %v1276_v42 }
 0x16f   : > { %v1289_v45 = vsub.f32 0.0, %v1285_v41 }
 0x170   : > { %v1288_v56 = vsub.f32 0.0, %v1284_v49 }
 0x171   : > { %v1295_v55 = vmul.f32 1.442695, %v1289_v45 }
 0x172   : > { %v2060_v57 = vpop.eup %2059  ;;  %v1293_v60 = vmul.f32 1.442695, %v1288_v56 }
 0x173   : > { %2061 = vpow2.f32 %v1295_v55  ;;  %v1299_v62 = vadd.f32 1.0, %v2060_v57 }
 0x174   : > { %v1280_v0 = vpop.xlane.xlu0 %1279  ;;  %2063 = vpow2.f32 %v1293_v60 }
 0x175   : > { %v1286_v1 = vadd.f32 %v1282_v36, %v1280_v0  ;;  %2065 = vrcp.f32 %v1299_v62 }
 0x177   : > { %v1290_v2 = vsub.f32 0.0, %v1286_v1 }
 0x179   : > { %v2062_v50 = vpop.eup %2061  ;;  %v1297_v4 = vmul.f32 1.442695, %v1290_v2 }
 0x17a   : > { %v1301_v48 = vadd.f32 1.0, %v2062_v50  ;;  %v2064_v7 = vpop.eup %2063 }
 0x17b   : > { %2067 = vpow2.f32 %v1297_v4  ;;  %v1300_v8 = vadd.f32 1.0, %v2064_v7  ;;  %v2066_v9 = vpop.eup %2065 }
 0x17c   : > { %2069 = vrcp.f32 %v1301_v48  ;;  %v1307_v47 = vpack.c.bf16 %v2066_v9, %v2066_v9 }
 0x17d   : > { %2071 = vrcp.f32 %v1300_v8 }
 0x17e   : > { %v1315_v10 = vunpack.c.l.bf16 %v1307_v47 }
 0x180   : > { %v1319_v46 = vmul.f32 %v1315_v10, %v1311_v63 }
 0x181   : > { %v2068_v11 = vpop.eup %2067 }
 0x182   : > { %v1302_v54 = vadd.f32 1.0, %v2068_v11  ;;  %v2070_v58 = vpop.eup %2069 }
 0x183   : > { %v2072_v61 = vpop.eup %2071  ;;  %v1309_v13 = vpack.c.bf16 %v2070_v58, %v2070_v58 }
 0x184   : > { %2073 = vrcp.f32 %v1302_v54  ;;  %v1308_v12 = vpack.c.bf16 %v2072_v61, %v2072_v61 }
 0x185   : > { %v1317_v19 = vunpack.c.l.bf16 %v1309_v13 }
 0x186   : > { %v1316_v14 = vunpack.c.l.bf16 %v1308_v12 }
 0x187   : > { %v1321_v59 = vmul.f32 %v1317_v19, %v1313_v17 }
 0x188   : > { %v1320_v15 = vmul.f32 %v1316_v14, %v1312_v51 }
 0x18a   : > { %v2074_v16 = vpop.eup %2073  ;;  %v1323_v21 = vpack.c.bf16 %v1320_v15, %v1319_v46 }
 0x18b   : > { %v1310_v20 = vpack.c.bf16 %v2074_v16, %v2074_v16 }
 0x18c   : > { %1401 = vmatmul.bf16.vlgmr.msra.gmra.mxu1 %v1323_v21 }
 0x18d   : > { %v1318_v22 = vunpack.c.l.bf16 %v1310_v20 }
 0x18f   : > { %v1322_v23 = vmul.f32 %v1318_v22, %v1314_v18 }
 0x191   : > { %v1324_v43 = vpack.c.bf16 %v1322_v23, %v1321_v59 }
 0x193   : > { %1406 = vmatmul.bf16.vlgmr.msra.gmra.mxu3 %v1324_v43 }
 0x209   : > { %v1402_v24 = vpop.f32.mrf.mxu1 }
 0x20a   : > { %v1403_v5 = vadd.f32 %v2058_v25, %v1402_v24 }
 0x211   : > { %v1404_v26 = vpop.f32.mrf.mxu1 }
 0x212   : > { %v1405_v44 = vadd.f32 %v2058_v25, %v1404_v26 }
 0x214   : > { %v2023_v52 = vpack.c.bf16 %v1405_v44, %v1403_v5 }
 0x216   : > { %v1407_v27 = vpop.f32.mrf.mxu3  ;;  %2024 = vst [vmem:[%s279_s4] sm:$0xff] %v2023_v52  }
 0x217   : > { %v1408_v29 = vadd.f32 %v2058_v25, %v1407_v27 }
 0x21e   : > { %v1409_v28 = vpop.f32.mrf.mxu3 }
 0x21f   : > { %v1410_v30 = vadd.f32 %v2058_v25, %v1409_v28 }
 0x221   : > { %v2028_v31 = vpack.c.bf16 %v1410_v30, %v1408_v29 }
 0x223   : > { %2030 = vst [vmem:[%s279_s4 + $0x8] sm:$0xff] %v2028_v31  }
 0x224 PF: > { %s18_s26 = sadd.s32 1, %s2081_s26  }
 0x225   : > { %p15_p4 = scmp.ge.s32.totalorder %s18_s26, 6  }
 0x227   :  { %17 = sbr.rel (!%p15_p4) target bundleno = 2 (0x2), region = 86 }

</bundles_post_ra>
